<compile_context>
chip_gen: v7x
topology: tpu7x:2x2x1
jax: 0.10.0
libtpu: 0.0.40
codegen_flags: <defaults>
</compile_context>

<pallas_src>
import functools

import jax
import jax.numpy as jnp
from jax.experimental import pallas as pl
from jax.experimental.pallas import tpu as pltpu

# ---------------------------------------------------------------------------
# Periodic table data (same convention as torchani: index 0 is a dummy slot,
# so PERIODIC_TABLE[1] == 'H' and ATOMIC_NUMBER['H'] == 1).
# ---------------------------------------------------------------------------
PERIODIC_TABLE = ["Dummy"] + """
H He
Li Be B C N O F Ne
Na Mg Al Si P S Cl Ar
K Ca Sc Ti V Cr Mn Fe Co Ni Cu Zn Ga Ge As Se Br Kr
Rb Sr Y Zr Nb Mo Tc Ru Rh Pd Ag Cd In Sn Sb Te I Xe
Cs Ba La Ce Pr Nd Pm Sm Eu Gd Tb Dy Ho Er Tm Yb Lu
Hf Ta W Re Os Ir Pt Au Hg Tl Pb Bi Po At Rn
Fr Ra Ac Th Pa U Np Pu Am Cm Bk Cf Es Fm Md No Lr
Rf Db Sg Bh Hs Mt Ds Rg Cn Nh Fl Mc Lv Ts Og
""".split()
ATOMIC_NUMBER = {s: i for i, s in enumerate(PERIODIC_TABLE)}

_LANE = 128
_MAX_BLOCK_ROWS = 4096     # 4096x128 int32 = 2 MiB per block per operand
_SINGLE_BLOCK_ROWS = 1024  # below this, a single (full-array) grid step


def _build_conv_table(symbols):
    """Deterministic equivalent of the PyTorch __init__ buffer construction."""
    rev_idx = {s: k for k, s in enumerate(PERIODIC_TABLE)}
    maxidx = max(rev_idx.values())
    table = [-1] * (maxidx + 2)  # shape (maxidx + 2,), filled with -1
    for i, s in enumerate(symbols):
        table[rev_idx[s]] = i
    return jnp.asarray(table, dtype=jnp.int32)


def _convert_kernel(z_list, x_ref, out_ref):
    xb = x_ref[...]                         # (block_rows, 128) int32
    out = jnp.full_like(xb, -1)             # default: padding / unsupported -> -1
    # Static unrolled compare against the tiny supported-element set.
    for i, z in enumerate(z_list):
        out = jnp.where(xb == jnp.int32(z), jnp.int32(i), out)
    out_ref[...] = out


def _species_convert_impl(atomic_nums, *, z_list):
    orig_shape = atomic_nums.shape
    # No-op when the caller already supplies int32 (recommended).
    x = atomic_nums.astype(jnp.int32).reshape(-1)
    total = int(x.shape[0])

    # Lane-dense layout: flatten so the last dim is 128 (unmasked vector stores).
    rows = max(1, -(-total // _LANE))
    padded_total = rows * _LANE
    needs_pad = padded_total != total
    if needs_pad:
        # Pad only to the next multiple of 128; tail is discarded, value irrelevant.
        x = jnp.pad(x, (0, padded_total - total))
    x2d = x.reshape(rows, _LANE)

    # Block-size selection: big blocks so per-step overhead is amortized, but
    # keep >= 2 grid steps for medium inputs so v7x's 2 TCs both stream data.
    if rows <= _SINGLE_BLOCK_ROWS:
        block_rows = rows                    # full-dim block, single grid step
    else:
        half = -(-rows // 2)
        block_rows = min(_MAX_BLOCK_ROWS, ((half + 7) // 8) * 8)
    grid = (pl.cdiv(rows, block_rows),)      # partial last block is masked by Pallas

    out2d = pl.pallas_call(
        functools.partial(_convert_kernel, z_list),
        out_shape=jax.ShapeDtypeStruct((rows, _LANE), jnp.int32),
        grid=grid,
        in_specs=[pl.BlockSpec((block_rows, _LANE), lambda i: (i, 0))],
        out_specs=pl.BlockSpec((block_rows, _LANE), lambda i: (i, 0)),
        compiler_params=pltpu.CompilerParams(
            dimension_semantics=("parallel",),
        ),
    )(x2d)

    out = out2d.reshape(-1)
    if needs_pad:
        out = out[:total]
    return out.reshape(orig_shape)


class SpeciesConverterPallas:
    """Convert atomic numbers into internal ANI element indices (Pallas TPU)."""

    def __init__(self, symbols):
        if isinstance(symbols, str):
            raise ValueError(
                "Pass a sequence like ['H', 'C', 'N', 'O'], not a string")
        # Kept for reference / parity with the torch module's buffers.
        self.conv_tensor = _build_conv_table(symbols)  # (maxidx + 2,)
        self.table_len = int(self.conv_tensor.shape[0])
        self.atomic_numbers = jnp.asarray(
            [ATOMIC_NUMBER[s] for s in symbols], dtype=jnp.int32)
        # Static python-side constants baked into the kernel trace.
        self._z_list = tuple(int(ATOMIC_NUMBER[s]) for s in symbols)
        # One fused executable per input shape (cast + pad + kernel + slice).
        self._jit_forward = jax.jit(
            functools.partial(_species_convert_impl, z_list=self._z_list))

    def __call__(self, atomic_nums, nop: bool = False):
        if nop:
            # TODO(synk): torch also asserts atomic_nums.max() < n_symbols here;
            # data-dependent host-side check, done outside the kernel if needed.
            return atomic_nums
        # NOTE: unmatched values (including negatives other than -1 and
        # unsupported elements) map to -1; torch's negative-index wraparound
        # and its host-side ValueError are not reproduced inside the kernel.
        # TODO(synk): torch raises ValueError on unsupported elements; that is a
        # data-dependent runtime assertion done outside the kernel if needed.
        return self._jit_forward(atomic_nums)


if __name__ == "__main__":
    key = jax.random.PRNGKey(0)
    converter = SpeciesConverterPallas(["H", "C", "N", "O"])

    choices = jnp.asarray([-1, 1, 6, 7, 8], dtype=jnp.int32)  # pad, H, C, N, O
    T = converter.table_len

    def reference(atomic_nums):
        # Pure-JAX reference of the torch semantics (with negative-index wrap).
        ref_idx = jnp.where(atomic_nums < 0, atomic_nums + T, atomic_nums)
        return converter.conv_tensor[ref_idx]

    # Case 1: total divisible by 128 -> fast path, no padding copy.
    k1, k2 = jax.random.split(key)
    molecules, atoms = 4, 32
    sel = jax.random.randint(k1, (molecules, atoms), 0, choices.shape[0])
    atomic_nums = choices[sel]
    out = jax.block_until_ready(converter(atomic_nums))
    assert out.shape == atomic_nums.shape
    assert out.dtype == jnp.int32
    assert bool(jnp.all(out == reference(atomic_nums)))

    # Case 2: ragged total (3*20 = 60) -> minimal-pad path + partial block.
    sel2 = jax.random.randint(k2, (3, 20), 0, choices.shape[0])
    atomic_nums2 = choices[sel2]
    out2 = jax.block_until_ready(converter(atomic_nums2))
    assert out2.shape == atomic_nums2.shape
    assert bool(jnp.all(out2 == reference(atomic_nums2)))

    print("KERNEL_OK")
</pallas_src>

<mosaic_0001>
module attributes {stable_mosaic.version = 11 : i64} {
  func.func @_convert_kernel(%arg0: i32, %arg1: memref<1x128xi32, #tpu.memory_space<vmem>>, %arg2: memref<1x128xi32, #tpu.memory_space<vmem>>) attributes {dimension_semantics = [#tpu.dimension_semantics<parallel>], iteration_bounds = array<i64: 1>, scalar_prefetch = 0 : i64, scratch_operands = 0 : i64, tpu.core_type = #tpu.core_type<tc>, window_params = [{transform_indices = @transform_0, window_bounds = array<i64: 1, 128>}, {transform_indices = @transform_1, window_bounds = array<i64: 1, 128>}]} {
    %c0 = arith.constant 0 : index
    %c0_0 = arith.constant 0 : index
    %0 = vector.load %arg1[%c0, %c0_0] : memref<1x128xi32, #tpu.memory_space<vmem>>, vector<1x128xi32>
    %c-1_i32 = arith.constant -1 : i32
    %1 = vector.broadcast %c-1_i32 : i32 to vector<1x128xi32>
    %c1_i32 = arith.constant 1 : i32
    %2 = vector.broadcast %c1_i32 : i32 to vector<1x128xi32>
    %3 = arith.cmpi eq, %0, %2 : vector<1x128xi32>
    %c0_i32 = arith.constant 0 : i32
    %4 = vector.broadcast %c0_i32 : i32 to vector<1x128xi32>
    %5 = arith.select %3, %4, %1 : vector<1x128xi1>, vector<1x128xi32>
    %c6_i32 = arith.constant 6 : i32
    %6 = vector.broadcast %c6_i32 : i32 to vector<1x128xi32>
    %7 = arith.cmpi eq, %0, %6 : vector<1x128xi32>
    %c1_i32_1 = arith.constant 1 : i32
    %8 = vector.broadcast %c1_i32_1 : i32 to vector<1x128xi32>
    %9 = arith.select %7, %8, %5 : vector<1x128xi1>, vector<1x128xi32>
    %c7_i32 = arith.constant 7 : i32
    %10 = vector.broadcast %c7_i32 : i32 to vector<1x128xi32>
    %11 = arith.cmpi eq, %0, %10 : vector<1x128xi32>
    %c2_i32 = arith.constant 2 : i32
    %12 = vector.broadcast %c2_i32 : i32 to vector<1x128xi32>
    %13 = arith.select %11, %12, %9 : vector<1x128xi1>, vector<1x128xi32>
    %c8_i32 = arith.constant 8 : i32
    %14 = vector.broadcast %c8_i32 : i32 to vector<1x128xi32>
    %15 = arith.cmpi eq, %0, %14 : vector<1x128xi32>
    %c3_i32 = arith.constant 3 : i32
    %16 = vector.broadcast %c3_i32 : i32 to vector<1x128xi32>
    %17 = arith.select %15, %16, %13 : vector<1x128xi1>, vector<1x128xi32>
    %c0_2 = arith.constant 0 : index
    %c0_3 = arith.constant 0 : index
    %18 = vector.load %arg2[%c0_2, %c0_3] : memref<1x128xi32, #tpu.memory_space<vmem>>, vector<1x128xi32>
    tpu.vector_store %arg2[%c0_2, %c0_3], %17 {strides = array<i32>} : memref<1x128xi32, #tpu.memory_space<vmem>>, vector<1x128xi32>,
    return
  }
  func.func @transform_0(%arg0: i32) -> (i32, i32) {
    %c0_i32 = arith.constant 0 : i32
    %c0_i32_0 = arith.constant 0 : i32
    return %arg0, %c0_i32 : i32, i32
  }
  func.func @transform_1(%arg0: i32) -> (i32, i32) {
    %c0_i32 = arith.constant 0 : i32
    %c0_i32_0 = arith.constant 0 : i32
    return %arg0, %c0_i32 : i32, i32
  }
}

</mosaic_0001>

<bundles_post_ra>
// kernel: _species_convert_impl.1
= control target key start
LH: loop header
LB: loop body
LE: loop exit
PB: predicated region body
PF: predicated region fallthrough
CT: control target
= control target key end

     0   :  { %v23_v1 = vmov 4294967295   ;;  %s40_s0 = inlined_call_operand.vmem [shape: s32[1,128], index: 0, kind: input, shape index: {}]   ;;  %s41_s1 = inlined_call_operand.vmem [shape: s32[1,128], index: 1, kind: output, shape index: {}]  }
   0x1   :  { %v8_v0 = vld [vmem:[%s40_s0] sm:$0x1] }
   0x2   :  { %vm9_vm0 = vcmp.eq.s32.totalorder %v8_v0, 1  ;;  %vm11_vm1 = vcmp.eq.s32.totalorder %v8_v0, 6  ;;  %vm13_vm2 = vcmp.eq.s32.totalorder %v8_v0, 7  ;;  %vm15_vm3 = vcmp.eq.s32.totalorder %v8_v0, 8 }
   0x3   :  { %v10_v2 = vsel %vm9_vm0, 0, %v23_v1 }
   0x4   :  { %v12_v3 = vsel %vm11_vm1, 1, %v10_v2 }
   0x5   :  { %v14_v4 = vsel %vm13_vm2, 2, %v12_v3 }
   0x6   :  { %v16_v5 = vsel %vm15_vm3, 3, %v14_v4 }
   0x7   :  { %17 = vst [vmem:[%s41_s1] sm:$0x1] %v16_v5 }

</bundles_post_ra>
